<compile_context>
chip_gen: v5e
topology: v5e:2x2
jax: 0.10.0
libtpu: 0.0.40
codegen_flags: <defaults>
</compile_context>

<pallas_src>
import math

import jax
import jax.numpy as jnp
from jax.experimental import pallas as pl
from jax.experimental.pallas import tpu as pltpu

TWO_PI = 2.0 * math.pi


def _round_up(n, m):
    return ((n + m - 1) // m) * m


def _learned_sinusoidal_kernel(x_ref, w_ref, sin_ref, cos_ref):
    # x_ref: (TILE_B, 1) f32, w_ref: (1, half_dim) f32
    # sin_ref / cos_ref: (TILE_B, half_dim) f32
    x = x_ref[...]                               # (TILE_B, 1)
    w = w_ref[...]                               # (1, half_dim)
    freqs = x * (w * TWO_PI)                     # (TILE_B, half_dim)
    sin_ref[...] = jnp.sin(freqs)
    cos_ref[...] = jnp.cos(freqs)


def learned_sinusoidal_pos_emb(x, weights, *, tile_b=1024):
    """x: (B,) float, weights: (half_dim,) float -> (B, 2*half_dim + 1) f32.

    Output layout matches the PyTorch module: [x, sin(2*pi*x*w), cos(2*pi*x*w)].
    """
    B = x.shape[0]
    half_dim = weights.shape[0]

    # Batch tile: multiple of 8, capped at `tile_b`; pad B up to whole tiles
    # (padded rows are sliced off afterwards).
    TILE_B = min(tile_b, _round_up(B, 8))
    B_pad = _round_up(B, TILE_B)
    grid = (B_pad // TILE_B,)

    x_f32 = x.astype(jnp.float32)
    x2d = jnp.zeros((B_pad, 1), jnp.float32).at[:B, 0].set(x_f32)
    w2d = weights.reshape(1, half_dim).astype(jnp.float32)

    sin_out, cos_out = pl.pallas_call(
        _learned_sinusoidal_kernel,
        out_shape=(
            jax.ShapeDtypeStruct((B_pad, half_dim), jnp.float32),
            jax.ShapeDtypeStruct((B_pad, half_dim), jnp.float32),
        ),
        grid_spec=pl.GridSpec(
            grid=grid,
            in_specs=[
                pl.BlockSpec((TILE_B, 1), lambda i: (i, 0)),
                pl.BlockSpec((1, half_dim), lambda i: (0, 0)),  # resident
            ],
            out_specs=(
                pl.BlockSpec((TILE_B, half_dim), lambda i: (i, 0)),
                pl.BlockSpec((TILE_B, half_dim), lambda i: (i, 0)),
            ),
        ),
        compiler_params=pltpu.CompilerParams(
            dimension_semantics=("parallel",),
        ),
    )(x2d, w2d)

    # Cheap wrapper-side assembly in exactly [x, sin, cos] order.
    fouriered = jnp.concatenate(
        (x_f32.reshape(B, 1), sin_out[:B], cos_out[:B]), axis=-1
    )
    return fouriered


def reference(x, weights):
    # Same multiply grouping as the kernel: x * (w * 2*pi).
    x2 = x.reshape(-1, 1).astype(jnp.float32)
    w2 = weights.reshape(1, -1).astype(jnp.float32)
    freqs = x2 * (w2 * TWO_PI)
    return jnp.concatenate((x2, jnp.sin(freqs), jnp.cos(freqs)), axis=-1)


if __name__ == "__main__":
    key = jax.random.PRNGKey(0)
    k_x, k_w = jax.random.split(key)

    B = 8
    dim = 32                     # module arg; half_dim = 16
    half_dim = dim // 2

    # Learned parameter init (matches torch.randn(half_dim) shape).
    weights = jax.random.normal(k_w, (half_dim,), dtype=jnp.float32)
    # Continuous diffusion timesteps in [0, 1) (v-diffusion convention).
    x = jax.random.uniform(k_x, (B,), dtype=jnp.float32)

    out = learned_sinusoidal_pos_emb(x, weights)
    out = jax.block_until_ready(out)

    ref = reference(x, weights)
    assert out.shape == (B, dim + 1), out.shape
    max_err = float(jnp.max(jnp.abs(out - ref)))
    assert jnp.allclose(out, ref, atol=1e-4, rtol=1e-4), max_err
    print("KERNEL_OK")
</pallas_src>

<mosaic_0001>
module attributes {stable_mosaic.version = 11 : i64} {
  func.func @_learned_sinusoidal_kernel(%arg0: i32, %arg1: memref<8x1xf32, #tpu.memory_space<vmem>>, %arg2: memref<1x16xf32, #tpu.memory_space<vmem>>, %arg3: memref<8x16xf32, #tpu.memory_space<vmem>>, %arg4: memref<8x16xf32, #tpu.memory_space<vmem>>) attributes {dimension_semantics = [#tpu.dimension_semantics<parallel>], iteration_bounds = array<i64: 1>, scalar_prefetch = 0 : i64, scratch_operands = 0 : i64, tpu.core_type = #tpu.core_type<tc>, window_params = [{transform_indices = @transform_0, window_bounds = array<i64: 8, 1>}, {pipeline_mode = #tpu.pipeline_mode<synchronous>, transform_indices = @transform_1, window_bounds = array<i64: 1, 16>}, {transform_indices = @transform_2, window_bounds = array<i64: 8, 16>}, {transform_indices = @transform_3, window_bounds = array<i64: 8, 16>}]} {
    %c0 = arith.constant 0 : index
    %c0_0 = arith.constant 0 : index
    %0 = vector.load %arg1[%c0, %c0_0] : memref<8x1xf32, #tpu.memory_space<vmem>>, vector<8x1xf32>
    %c0_1 = arith.constant 0 : index
    %c0_2 = arith.constant 0 : index
    %1 = vector.load %arg2[%c0_1, %c0_2] : memref<1x16xf32, #tpu.memory_space<vmem>>, vector<1x16xf32>
    %cst = arith.constant 6.28318548 : f32
    %2 = vector.broadcast %cst : f32 to vector<1x16xf32>
    %3 = arith.mulf %1, %2 : vector<1x16xf32>
    %4 = vector.broadcast %0 : vector<8x1xf32> to vector<8x16xf32>
    %5 = vector.broadcast %3 : vector<1x16xf32> to vector<8x16xf32>
    %6 = arith.mulf %4, %5 : vector<8x16xf32>
    %7 = math.sin %6 : vector<8x16xf32>
    %c0_3 = arith.constant 0 : index
    %c0_4 = arith.constant 0 : index
    %8 = vector.load %arg3[%c0_3, %c0_4] : memref<8x16xf32, #tpu.memory_space<vmem>>, vector<8x16xf32>
    tpu.vector_store %arg3[%c0_3, %c0_4], %7 {strides = array<i32>} : memref<8x16xf32, #tpu.memory_space<vmem>>, vector<8x16xf32>,
    %9 = math.cos %6 : vector<8x16xf32>
    %c0_5 = arith.constant 0 : index
    %c0_6 = arith.constant 0 : index
    %10 = vector.load %arg4[%c0_5, %c0_6] : memref<8x16xf32, #tpu.memory_space<vmem>>, vector<8x16xf32>
    tpu.vector_store %arg4[%c0_5, %c0_6], %9 {strides = array<i32>} : memref<8x16xf32, #tpu.memory_space<vmem>>, vector<8x16xf32>,
    return
  }
  func.func @transform_0(%arg0: i32) -> (i32, i32) {
    %c0_i32 = arith.constant 0 : i32
    %c0_i32_0 = arith.constant 0 : i32
    return %arg0, %c0_i32 : i32, i32
  }
  func.func @transform_1(%arg0: i32) -> (i32, i32) {
    %c0_i32 = arith.constant 0 : i32
    %c0_i32_0 = arith.constant 0 : i32
    %c0_i32_1 = arith.constant 0 : i32
    return %c0_i32, %c0_i32_0 : i32, i32
  }
  func.func @transform_2(%arg0: i32) -> (i32, i32) {
    %c0_i32 = arith.constant 0 : i32
    %c0_i32_0 = arith.constant 0 : i32
    return %arg0, %c0_i32 : i32, i32
  }
  func.func @transform_3(%arg0: i32) -> (i32, i32) {
    %c0_i32 = arith.constant 0 : i32
    %c0_i32_0 = arith.constant 0 : i32
    return %arg0, %c0_i32 : i32, i32
  }
}

</mosaic_0001>

<bundles_post_ra>
// kernel: tpu_custom_call.1
= control target key start
LH: loop header
LB: loop body
LE: loop exit
PB: predicated region body
PF: predicated region fallthrough
CT: control target
= control target key end

     0   :  { %9 = vsyncpa [#allocation3], 0  ;;  %v439_v1 = vmov 0   ;;  %s544_s0 = inlined_call_operand.vmem [shape: f32[8,1], index: 0, kind: input, shape index: {}]   ;;  %s545_s1 = inlined_call_operand.vmem [shape: f32[1,16], index: 1, kind: input, shape index: {}]   ;;  %s546_s2 = inlined_call_operand.hbm [shape: f32[8,16], index: 2, kind: output, shape index: {0}]   ;;  %s547_s3 = inlined_call_operand.hbm [shape: f32[8,16], index: 3, kind: output, shape index: {1}]  }
   0x1   :  { %v15_v0 = vld [vmem:[%s544_s0] sm:$0xff]  ;;  %386 = vset.pattern.permute.xlu0 %v439_v1 }
   0x2   :  { %20 = vperm.xlu0 %386, %v15_v0  }
   0x3   :  { %10 = vsyncpa [#allocation5], 0  ;;  %v16_v2 = vld [vmem:[%s545_s1] sm:$0x1]  ;;  %v440_v18 = vmov 683565275  }
   0x4   :  { %v17_v3 = vmul.f32 6.2831855, %v16_v2  ;;  %v441_v20 = vmov 2475754826   ;;  %v442_v23 = vmov 2131351028  }
   0x5   :  { %v443_v26 = vmov 2102212464   ;;  %v444_v29 = vmov 920167782   ;;  %v445_v32 = vmov 1326507024  }
   0x6   :  { %v24_v4 = vperm.slane %v17_v3, 0  ;;  %s446_s0 = smov [#allocation2]   ;;  %s346_s18 = sshll.u32 %s546_s2, 4  ;;  %s347_s18 = int_to_ptr.hbm [resolvable:$true] %s346_s18 }
   0x7   :  { %s344_s1 = sshll.u32 %s446_s0, 4  ;;  %s447_s19 = smov [#allocation4]   ;;  %s345_s1 = int_to_ptr.vmem [resolvable:$true] %s344_s1 }
   0x8   :  { %s355_s20 = sshll.u32 %s447_s19, 4  ;;  %s357_s23 = sshll.u32 %s547_s3, 4  ;;  %s356_s20 = int_to_ptr.vmem [resolvable:$true] %s355_s20  ;;  %s358_s23 = int_to_ptr.hbm [resolvable:$true] %s357_s23 }
  0x74   :  { %v21_v5 = vpop.permute.xlu0 %20 }
  0x75   :  { %v475_v6 = vmul.f32 %v24_v4, %v21_v5 }
  0x77   :  { %v30_v7 = vand.u32 2139095040, %v475_v6  ;;  %v27_v10 = vand.u32 2147483647, %v475_v6  ;;  %vm29_vm12 = vcmp.lt.s32.totalorder %v475_v6, 0 }
  0x79   :  { %v31_v8 = vshrl.u32 %v30_v7, 23  ;;  %v34_v12 = vand.u32 8388607, %v27_v10  ;;  %vm28_vm13 = vcmp.le.f32.partialorder %v27_v10, 0.7853982 }
  0x7b   :  { %v371_v9 = vadd.s32 4294967169, %v31_v8  ;;  %v35_v16 = vor.u32 8388608, %v34_v12 }
  0x7d   :  { %v37_v11 = vadd.s32 1, %v371_v9  ;;  %v492_v39 = vshll.u32 %v35_v16, 8 }
  0x7f   :  { %vm38_vm0 = vcmp.gt.s32.totalorder %v37_v11, 0  ;;  %v76_v48 = vand.u32 65535, %v492_v39  ;;  %v77_v49 = vshrl.u32 %v492_v39, 16 }
  0x80   :  { %v39_v13 = vsel %vm38_vm0, %v37_v11, 0 }
  0x81   :  { %v41_v14 = vand.u32 31, %v39_v13  ;;  %v483_v17 = vshrl.u32 %v39_v13, 5 }
  0x83   :  { %v481_v15 = vsub.s32 32, %v41_v14  ;;  %v44_v19 = vshll.u32 %v440_v18, %v41_v14  ;;  %v47_v21 = vshll.u32 %v441_v20, %v41_v14  ;;  %v50_v25 = vshll.u32 %v442_v23, %v41_v14 }
  0x84   :  { %v53_v28 = vshll.u32 %v443_v26, %v41_v14  ;;  %v56_v31 = vshll.u32 %v444_v29, %v41_v14  ;;  %vm59_vm1 = vcmp.lt.s32.totalorder %v483_v17, 1  ;;  %vm62_vm2 = vcmp.lt.s32.totalorder %v483_v17, 4 }
  0x85   :  { %v45_v22 = vshrl.u32 %v441_v20, %v481_v15  ;;  %v48_v24 = vshrl.u32 %v442_v23, %v481_v15  ;;  %v51_v27 = vshrl.u32 %v443_v26, %v481_v15  ;;  %v54_v30 = vshrl.u32 %v444_v29, %v481_v15 }
  0x86   :  { %v57_v33 = vshrl.u32 %v445_v32, %v481_v15  ;;  %vm61_vm3 = vcmp.lt.s32.totalorder %v483_v17, 3  ;;  %vm60_vm4 = vcmp.lt.s32.totalorder %v483_v17, 2  ;;  %v43_v13 = vshrl.u32 %v440_v18, %v481_v15 }
  0x87   :  { %v46_v34 = vor.u32 %v45_v22, %v44_v19  ;;  %v49_v35 = vor.u32 %v48_v24, %v47_v21  ;;  %v52_v36 = vor.u32 %v51_v27, %v50_v25  ;;  %v55_v37 = vor.u32 %v54_v30, %v53_v28 }
  0x88   :  { %v58_v38 = vor.u32 %v57_v33, %v56_v31 }
  0x89   :  { %v67_v40 = vsel %vm59_vm1, %v46_v34, %v49_v35  ;;  %v71_v41 = vsel %vm59_vm1, %v49_v35, %v52_v36  ;;  %v68_v42 = vsel %vm62_vm2, %v55_v37, 920167782  ;;  %v64_v9 = vsel %vm62_vm2, %v52_v36, 2102212464 }
  0x8a   :  { %v72_v43 = vsel %vm62_vm2, %v58_v38, 1326507024  ;;  %v69_v44 = vsel %vm61_vm3, %v52_v36, %v68_v42  ;;  %v63_v22 = vsel %vm59_vm1, %v43_v13, %v46_v34  ;;  %v65_v23 = vsel %vm61_vm3, %v49_v35, %v64_v9 }
  0x8b   :  { %v73_v45 = vsel %vm61_vm3, %v55_v37, %v72_v43  ;;  %v70_v46 = vsel %vm60_vm4, %v67_v40, %v69_v44  ;;  %v66_v15 = vsel %vm60_vm4, %v63_v22, %v65_v23 }
  0x8c   :  { %v74_v47 = vsel %vm60_vm4, %v71_v41, %v73_v45  ;;  %v100_v52 = vand.u32 65535, %v70_v46  ;;  %v101_v53 = vshrl.u32 %v70_v46, 16  ;;  %v120_v30 = vmul.u32 %v492_v39, %v66_v15 }
  0x8d   :  { %v78_v50 = vand.u32 65535, %v74_v47  ;;  %v79_v51 = vshrl.u32 %v74_v47, 16  ;;  %vm182_vm4 = vcmask 130048  }
  0x8e   :  { %v103_v56 = vmul.u32 %v101_v53, %v76_v48  ;;  %v104_v57 = vmul.u32 %v100_v52, %v77_v49  ;;  %v102_v61 = vmul.u32 %v100_v52, %v76_v48  ;;  %v105_v2 = vmul.u32 %v101_v53, %v77_v49 }
  0x8f   :  { %v81_v54 = vmul.u32 %v79_v51, %v76_v48  ;;  %v82_v55 = vmul.u32 %v78_v50, %v77_v49  ;;  %v80_v58 = vmul.u32 %v78_v50, %v76_v48  ;;  %v83_v60 = vmul.u32 %v79_v51, %v77_v49 }
  0x90   :  { %v106_v62 = vshll.u32 %v103_v56, 16  ;;  %v108_v4 = vshll.u32 %v104_v57, 16  ;;  %v107_v20 = vshrl.u32 %v103_v56, 16  ;;  %v109_v26 = vshrl.u32 %v104_v57, 16 }
  0x91   :  { %v84_v59 = vshll.u32 %v81_v54, 16  ;;  %v86_v63 = vshll.u32 %v82_v55, 16  ;;  %v85_v14 = vshrl.u32 %v81_v54, 16  ;;  %v87_v24 = vshrl.u32 %v82_v55, 16 }
  0x92   :  { %vm110_vm6 = vc.u32 %v102_v61, %v106_v62  ;;  %v112_v5 = vadd.s32 %v106_v62, %v102_v61 }
  0x93   :  { %vm88_vm5 = vc.u32 %v80_v58, %v84_v59  ;;  %v90_v0 = vadd.s32 %v84_v59, %v80_v58  ;;  %v111_v8 = vsel %vm110_vm6, 1, %v439_v1 }
  0x94   :  { %v89_v3 = vsel %vm88_vm5, 1, %v439_v1  ;;  %v113_v12 = vadd.s32 %v111_v8, %v105_v2  ;;  %vm114_vm8 = vc.u32 %v112_v5, %v108_v4  ;;  %v116_v29 = vadd.s32 %v112_v5, %v108_v4 }
  0x95   :  { %v91_v7 = vadd.s32 %v89_v3, %v83_v60  ;;  %vm92_vm7 = vc.u32 %v90_v0, %v86_v63  ;;  %v115_v19 = vsel %vm114_vm8, 1, %v439_v1  ;;  %vm170_vm5 = vweird.f32 %v475_v6 }
  0x96   :  { %v93_v11 = vsel %vm92_vm7, 1, %v439_v1  ;;  %v117_v21 = vadd.s32 %v115_v19, %v113_v12 }
  0x97   :  { %v95_v16 = vadd.s32 %v93_v11, %v91_v7 }
  0x98   :  { %v118_v27 = vadd.s32 %v117_v21, %v107_v20 }
  0x99   :  { %v96_v25 = vadd.s32 %v95_v16, %v85_v14 }
  0x9a   :  { %v119_v18 = vadd.s32 %v118_v27, %v109_v26 }
  0x9b   :  { %v97_v28 = vadd.s32 %v96_v25, %v87_v24 }
  0x9c   :  { %v123_v1 = vadd.s32 1, %v119_v18 }
  0x9d   :  { %vm122_vm9 = vc.u32 %v97_v28, %v116_v29  ;;  %v121_v17 = vadd.s32 %v116_v29, %v97_v28 }
  0x9e   :  { %v124_v31 = vsel %vm122_vm9, %v123_v1, %v119_v18 }
  0x9f   :  { %v125_v32 = vadd.s32 %v124_v31, %v120_v30 }
  0xa1   :  { %v126_v33 = vadd.s32 536870912, %v125_v32 }
  0xa3   :  { %v127_v34 = vshrl.u32 %v126_v33, 30 }
  0xa5   :  { %v128_v36 = vshll.u32 %v127_v34, 30  ;;  %v151_v55 = vsub.s32 4, %v127_v34 }
  0xa7   :  { %v129_v35 = vsub.s32 %v125_v32, %v128_v36  ;;  %v152_v60 = vsel %vm29_vm12, %v151_v55, %v127_v34 }
  0xa8   :  { %v154_v63 = vsel %vm28_vm13, 0, %v152_v60 }
  0xa9   :  { %vm130_vm10 = vcmp.lt.s32.totalorder %v129_v35, 0  ;;  %v131_v37 = vsub.s32 0, %v129_v35  ;;  %v171_v5 = vadd.s32 3, %v154_v63  ;;  %v328_v11 = vand.u32 3, %v154_v63 }
  0xab   :  { %v132_v38 = vsel %vm130_vm10, %v131_v37, %v129_v35  ;;  %v172_v12 = vand.u32 3, %v171_v5  ;;  %vm329_vm14 = vcmp.lt.s32.totalorder %v328_v11, 2  ;;  %vm330_vm15 = vcmp.eq.s32.totalorder %v328_v11, 0 }
  0xac   :  { %v133_v40 = vclz %v132_v38  ;;  %vm333_vm0 = vcmp.eq.s32.totalorder %v328_v11, 2 }
  0xad   :  { %vm173_vm1 = vcmp.lt.s32.totalorder %v172_v12, 2  ;;  %vm174_vm2 = vcmp.eq.s32.totalorder %v172_v12, 0  ;;  %vm177_vm3 = vcmp.eq.s32.totalorder %v172_v12, 2 }
  0xae   :  { %v372_v41 = vadd.s32 4294967294, %v133_v40 }
  0xb0   :  { %vm373_vm11 = vcmp.lt.s32.totalorder %v372_v41, 0 }
  0xb1   :  { %v136_v42 = vsel %vm373_vm11, 0, %v372_v41 }
  0xb2   :  { %v137_v43 = vsub.s32 32, %v136_v42  ;;  %v141_v44 = vsub.s32 4294967266, %v136_v42  ;;  %v138_v45 = vshll.u32 %v129_v35, %v136_v42 }
  0xb4   :  { %v139_v46 = vshrl.u32 %v121_v17, %v137_v43  ;;  %v142_v47 = vadd.s32 127, %v141_v44 }
  0xb6   :  { %v140_v39 = vor.u32 %v139_v46, %v138_v45  ;;  %v143_v48 = vshll.u32 %v142_v47, 23 }
  0xb8   :  { %v144_v49 = vor.u32 4788187, %v143_v48  ;;  %v147_v51 = vcvt.s32.f32 %v140_v39 }
  0xba   :  { %v145_v50 = vand.u32 2147483647, %v144_v49 }
  0xbc   :  { %v148_v52 = vmul.f32 %v147_v51, %v145_v50 }
  0xbe   :  { %v149_v53 = vxor.u32 2147483648, %v148_v52 }
  0xc0   :  { %v150_v54 = vsel %vm29_vm12, %v149_v53, %v148_v52 }
  0xc1   :  { %v153_v56 = vsel %vm28_vm13, %v475_v6, %v150_v54 }
  0xc2   :  { %v155_v57 = vmul.f32 %v153_v56, %v153_v56 }
  0xc4   :  { %v156_v58 = vmul.f32 -0.001358992, %v155_v57  ;;  %v163_v59 = vmul.f32 -0.00019511016, %v155_v57 }
  0xc6   :  { %v157_v61 = vadd.f32 0.041655596, %v156_v58  ;;  %v164_v62 = vadd.f32 0.008332121, %v163_v59 }
  0xc8   :  { %v158_v0 = vmul.f32 %v157_v61, %v155_v57  ;;  %v165_v2 = vmul.f32 %v164_v62, %v155_v57 }
  0xca   :  { %v159_v3 = vadd.f32 -0.4999988, %v158_v0  ;;  %v166_v4 = vadd.f32 -0.16666654, %v165_v2 }
  0xcc   :  { %v160_v7 = vmul.f32 %v159_v3, %v155_v57  ;;  %v167_v8 = vmul.f32 %v166_v4, %v155_v57 }
  0xce   :  { %v161_v9 = vadd.f32 1.0, %v160_v7  ;;  %v168_v10 = vadd.f32 1.0, %v167_v8 }
  0xd0   :  { %v169_v13 = vmul.f32 %v168_v10, %v153_v56  ;;  %v178_v14 = vxor.u32 2147483648, %v161_v9 }
  0xd2   :  { %v175_v16 = vxor.u32 2147483648, %v169_v13  ;;  %v179_v20 = vsel %vm177_vm3, %v178_v14, %v169_v13  ;;  %v335_v22 = vsel %vm333_vm0, %v178_v14, %v169_v13 }
  0xd4   :  { %v176_v19 = vsel %vm174_vm2, %v161_v9, %v175_v16  ;;  %v332_v21 = vsel %vm330_vm15, %v161_v9, %v175_v16 }
  0xd5   :  { %v180_v23 = vsel %vm173_vm1, %v176_v19, %v179_v20  ;;  %v336_v24 = vsel %vm329_vm14, %v332_v21, %v335_v22 }
  0xd6   :  { %v181_v25 = vsel %vm170_vm5, nan, %v180_v23  ;;  %v337_v26 = vsel %vm170_vm5, nan, %v336_v24 }
  0xd7   :  { %183 = vst.msk [vmem:[#allocation2] sm:$0xff] %vm182_vm4, %v181_v25 }
  0xd8   :  { %349 = dma.vmem_to_hbm [thread:$0]  %s345_s1, 128, %s347_s18, [#allocation3]   ;;  %338 = vst.msk [vmem:[#allocation4] sm:$0xff] %vm182_vm4, %v337_v26 }
  0xd9   :  { %360 = dma.vmem_to_hbm [thread:$0]  %s356_s20, 128, %s358_s23, [#allocation5]  }
  0xda   :  { %435 = dma.done.wait [#allocation3], 128  }
  0xdb   :  { %436 = vsyncadd [#allocation3], 4294967168 }
  0xdc   :  { %437 = dma.done.wait [#allocation5], 128  }
  0xdd   :  { %438 = vsyncadd [#allocation5], 4294967168 }
  0xde   :  { %369 = vsyncpa [#allocation3], 1 }
  0xdf   :  { %370 = vsyncpa [#allocation5], 1 }

</bundles_post_ra>
